<compile_context>
chip_gen: v7x
topology: tpu7x:2x2x1
jax: 0.10.0
libtpu: 0.0.40
codegen_flags: <defaults>
</compile_context>

<pallas_src>
import functools

import jax
import jax.numpy as jnp
from jax import lax
from jax.experimental import pallas as pl
from jax.experimental.pallas import tpu as pltpu

NEG_INF = jnp.float32(-1e9)   # matches the PyTorch -1000000000.0


def _round_up(x, m):
    return (x + m - 1) // m * m


def actor_critic_kernel(obs_ref, amask_ref,
                        w1_ref, b1_ref, w2_ref, b2_ref,
                        wh_ref, bh_ref,
                        lv_ref, logp_ref, *, value_col):
    """One batch tile: shared MLP + fused actor/critic head + log_softmax.

    obs_ref   : (TB, OBS_PAD) f32
    amask_ref : (TB, HP)      f32 additive mask (0 = valid, -1e9 = invalid/padded)
    w*_ref    : bf16 weights (VMEM-resident across the grid); b*_ref : f32 biases
    lv_ref    : (TB, HP) f32  lanes [0, A) = masked logits, lane A = critic value
    logp_ref  : (TB, HP) f32  log_softmax of the masked logits
    """
    obs = obs_ref[...]

    # Shared MLP: bf16 operands into the MXU, f32 accumulation, f32 elementwise.
    h1 = jnp.tanh(
        jnp.dot(obs.astype(jnp.bfloat16), w1_ref[...],
                preferred_element_type=jnp.float32) + b1_ref[...])
    h2 = jnp.tanh(
        jnp.dot(h1.astype(jnp.bfloat16), w2_ref[...],
                preferred_element_type=jnp.float32) + b2_ref[...])

    # Fused actor + critic head: a single lane-dense matmul.
    heads = jnp.dot(h2.astype(jnp.bfloat16), wh_ref[...],
                    preferred_element_type=jnp.float32) + bh_ref[...]

    # Valid-action masking (additive). Padded lanes and the value lane also get
    # -1e9 so log_softmax over the padded width stays correct.
    logits = heads + amask_ref[...]

    # Categorical(logits) -> normalized log-probs.
    m = jnp.max(logits, axis=-1, keepdims=True)
    z = logits - m
    lse = jnp.log(jnp.sum(jnp.exp(z), axis=-1, keepdims=True))
    logp_ref[...] = z - lse

    # Pack the critic value into lane `value_col` of the logits slab so the
    # value output does not need a lane-sparse (TB, 1) store.
    col = lax.broadcasted_iota(jnp.int32, logits.shape, 1)
    lv_ref[...] = jnp.where(col == value_col, heads, logits)


def pack_params(params, obs_size):
    """One-time packing: pad obs dim, fuse actor/critic heads, cast weights bf16."""
    A = params["wa"].shape[1]
    obs_pad = _round_up(obs_size, 128)
    head_pad = _round_up(A + 1, 128)

    w1 = jnp.zeros((obs_pad, 256), jnp.bfloat16)
    w1 = w1.at[:obs_size, :].set(params["w1"].astype(jnp.bfloat16))
    w2 = params["w2"].astype(jnp.bfloat16)

    wh = jnp.zeros((128, head_pad), jnp.bfloat16)
    wh = wh.at[:, :A].set(params["wa"].astype(jnp.bfloat16))
    wh = wh.at[:, A:A + 1].set(params["wc"].astype(jnp.bfloat16))

    bh = jnp.zeros((1, head_pad), jnp.float32)
    bh = bh.at[:, :A].set(params["ba"].astype(jnp.float32))
    bh = bh.at[:, A:A + 1].set(params["bc"].astype(jnp.float32))

    return dict(w1=w1, b1=params["b1"].astype(jnp.float32),
                w2=w2, b2=params["b2"].astype(jnp.float32),
                wh=wh, bh=bh,
                A=A, obs_size=obs_size, obs_pad=obs_pad, head_pad=head_pad)


def actor_critic_forward(obs, valid_actions_mask, packed, *, tile_b=256):
    """obs: (B, obs_size) f32; valid_actions_mask: (B, A) int (1 = valid).

    Returns (masked_logits, log_probs, value) with the original (unpadded) shapes.
    """
    B = obs.shape[0]
    A, obs_size = packed["A"], packed["obs_size"]
    obs_pad, head_pad = packed["obs_pad"], packed["head_pad"]

    tile_b = min(tile_b, _round_up(B, 8))
    b_pad = _round_up(B, tile_b)

    obs_p = jnp.zeros((b_pad, obs_pad), jnp.float32)
    obs_p = obs_p.at[:B, :obs_size].set(obs.astype(jnp.float32))

    # Additive mask: 0.0 for valid actions, -1e9 for invalid / padded lanes / rows.
    amask = jnp.full((b_pad, head_pad), NEG_INF, jnp.float32)
    amask = amask.at[:B, :A].set(
        jnp.where(valid_actions_mask != 0, 0.0, NEG_INF).astype(jnp.float32))

    kernel = functools.partial(actor_critic_kernel, value_col=A)

    lv, logp = pl.pallas_call(
        kernel,
        out_shape=(jax.ShapeDtypeStruct((b_pad, head_pad), jnp.float32),
                   jax.ShapeDtypeStruct((b_pad, head_pad), jnp.float32)),
        grid_spec=pltpu.PrefetchScalarGridSpec(
            num_scalar_prefetch=0,
            grid=(b_pad // tile_b,),
            in_specs=[
                pl.BlockSpec((tile_b, obs_pad), lambda i: (i, 0)),
                pl.BlockSpec((tile_b, head_pad), lambda i: (i, 0)),
                # weights / biases: constant block index -> VMEM-resident
                pl.BlockSpec((obs_pad, 256), lambda i: (0, 0)),
                pl.BlockSpec((1, 256), lambda i: (0, 0)),
                pl.BlockSpec((256, 128), lambda i: (0, 0)),
                pl.BlockSpec((1, 128), lambda i: (0, 0)),
                pl.BlockSpec((128, head_pad), lambda i: (0, 0)),
                pl.BlockSpec((1, head_pad), lambda i: (0, 0)),
            ],
            out_specs=[
                pl.BlockSpec((tile_b, head_pad), lambda i: (i, 0)),
                pl.BlockSpec((tile_b, head_pad), lambda i: (i, 0)),
            ]),
        compiler_params=pltpu.CompilerParams(
            dimension_semantics=("parallel",)),   # megacore on v7x, no-op otherwise
    )(obs_p, amask,
      packed["w1"], packed["b1"], packed["w2"], packed["b2"],
      packed["wh"], packed["bh"])

    logits = lv[:B, :A]
    value = lv[:B, A:A + 1]
    log_probs = logp[:B, :A]
    return logits, log_probs, value


def init_params(key, obs_size, action_size):
    """Deterministic synthetic init (PyTorch-Linear-like uniform fan-in).

    Weights are stored transposed vs. PyTorch, i.e. (in_features, out_features).
    """
    ks = jax.random.split(key, 8)

    def lin(kw, kb, fan_in, fan_out):
        bound = 1.0 / jnp.sqrt(jnp.float32(fan_in))
        w = jax.random.uniform(kw, (fan_in, fan_out), jnp.float32, -bound, bound)
        b = jax.random.uniform(kb, (1, fan_out), jnp.float32, -bound, bound)
        return w, b

    w1, b1 = lin(ks[0], ks[1], obs_size, 256)
    w2, b2 = lin(ks[2], ks[3], 256, 128)
    wa, ba = lin(ks[4], ks[5], 128, action_size)
    wc, bc = lin(ks[6], ks[7], 128, 1)
    return dict(w1=w1, b1=b1, w2=w2, b2=b2, wa=wa, ba=ba, wc=wc, bc=bc)


def reference_forward(obs, mask, p):
    """Pure-JAX reference mirroring the kernel's bf16-weight / f32-accum math."""
    bf = jnp.bfloat16
    h1 = jnp.tanh(jnp.dot(obs.astype(bf), p["w1"].astype(bf),
                          preferred_element_type=jnp.float32) + p["b1"])
    h2 = jnp.tanh(jnp.dot(h1.astype(bf), p["w2"].astype(bf),
                          preferred_element_type=jnp.float32) + p["b2"])
    logits = jnp.dot(h2.astype(bf), p["wa"].astype(bf),
                     preferred_element_type=jnp.float32) + p["ba"]
    logits = jnp.where(mask != 0, logits, NEG_INF)   # PyTorch-style exact mask
    logp = jax.nn.log_softmax(logits, axis=-1)
    value = jnp.dot(h2.astype(bf), p["wc"].astype(bf),
                    preferred_element_type=jnp.float32) + p["bc"]
    return logits, logp, value


if __name__ == "__main__":
    # TODO(synk): Categorical sampling (get_action) and the autograd-based
    # get_local_feature_importance are not part of the forward kernel; the
    # distribution is returned as normalized log-probs.
    B, OBS, ACT = 2, 32, 8

    key = jax.random.PRNGKey(0)
    k_obs, k_mask, k_par = jax.random.split(key, 3)

    obs = jax.random.normal(k_obs, (B, OBS), jnp.float32)
    # deterministic valid-action mask with at least one valid action per row
    mask = (jax.random.uniform(k_mask, (B, ACT)) > 0.3).astype(jnp.int32)
    mask = mask.at[:, 0].set(1)

    params = init_params(k_par, OBS, ACT)
    packed = pack_params(params, OBS)

    logits, logp, value = actor_critic_forward(obs, mask, packed)
    jax.block_until_ready((logits, logp, value))

    ref_logits, ref_logp, ref_value = reference_forward(obs, mask, params)

    # Valid lanes match tightly; invalid lanes differ only by O(logit) on a
    # -1e9 base (additive vs. in-place masking), absorbed by rtol.
    assert jnp.allclose(logits, ref_logits, rtol=1e-4, atol=5e-3)
    assert jnp.allclose(logp, ref_logp, rtol=1e-4, atol=5e-3)
    assert jnp.allclose(value, ref_value, rtol=1e-4, atol=5e-3)

    print("KERNEL_OK")
</pallas_src>

<mosaic_0001>
module attributes {stable_mosaic.version = 11 : i64} {
  func.func @actor_critic_kernel(%arg0: i32, %arg1: memref<8x128xf32, #tpu.memory_space<vmem>>, %arg2: memref<8x128xf32, #tpu.memory_space<vmem>>, %arg3: memref<128x256xbf16, #tpu.memory_space<vmem>>, %arg4: memref<1x256xf32, #tpu.memory_space<vmem>>, %arg5: memref<256x128xbf16, #tpu.memory_space<vmem>>, %arg6: memref<1x128xf32, #tpu.memory_space<vmem>>, %arg7: memref<128x128xbf16, #tpu.memory_space<vmem>>, %arg8: memref<1x128xf32, #tpu.memory_space<vmem>>, %arg9: memref<8x128xf32, #tpu.memory_space<vmem>>, %arg10: memref<8x128xf32, #tpu.memory_space<vmem>>) attributes {dimension_semantics = [#tpu.dimension_semantics<parallel>], iteration_bounds = array<i64: 1>, scalar_prefetch = 0 : i64, scratch_operands = 0 : i64, tpu.core_type = #tpu.core_type<tc>, window_params = [{transform_indices = @transform_0, window_bounds = array<i64: 8, 128>}, {transform_indices = @transform_1, window_bounds = array<i64: 8, 128>}, {pipeline_mode = #tpu.pipeline_mode<synchronous>, transform_indices = @transform_2, window_bounds = array<i64: 128, 256>}, {pipeline_mode = #tpu.pipeline_mode<synchronous>, transform_indices = @transform_3, window_bounds = array<i64: 1, 256>}, {pipeline_mode = #tpu.pipeline_mode<synchronous>, transform_indices = @transform_4, window_bounds = array<i64: 256, 128>}, {pipeline_mode = #tpu.pipeline_mode<synchronous>, transform_indices = @transform_5, window_bounds = array<i64: 1, 128>}, {pipeline_mode = #tpu.pipeline_mode<synchronous>, transform_indices = @transform_6, window_bounds = array<i64: 128, 128>}, {pipeline_mode = #tpu.pipeline_mode<synchronous>, transform_indices = @transform_7, window_bounds = array<i64: 1, 128>}, {transform_indices = @transform_8, window_bounds = array<i64: 8, 128>}, {transform_indices = @transform_9, window_bounds = array<i64: 8, 128>}]} {
    %c0 = arith.constant 0 : index
    %c0_0 = arith.constant 0 : index
    %0 = vector.load %arg1[%c0, %c0_0] : memref<8x128xf32, #tpu.memory_space<vmem>>, vector<8x128xf32>
    %1 = arith.truncf %0 : vector<8x128xf32> to vector<8x128xbf16>
    %c0_1 = arith.constant 0 : index
    %c0_2 = arith.constant 0 : index
    %2 = vector.load %arg3[%c0_1, %c0_2] : memref<128x256xbf16, #tpu.memory_space<vmem>>, vector<128x256xbf16>
    %cst = arith.constant dense<0.000000e+00> : vector<8x256xf32>
    %3 = tpu.matmul %1, %2, %cst {dimension_numbers = #tpu.dot_dimension_numbers<[1], [0], [0], [1], [0, 0, 1, 1], [], []>} : vector<8x128xbf16>, vector<128x256xbf16>, vector<8x256xf32> -> vector<8x256xf32>
    %c0_3 = arith.constant 0 : index
    %c0_4 = arith.constant 0 : index
    %4 = vector.load %arg4[%c0_3, %c0_4] : memref<1x256xf32, #tpu.memory_space<vmem>>, vector<1x256xf32>
    %5 = vector.broadcast %4 : vector<1x256xf32> to vector<8x256xf32>
    %6 = arith.addf %3, %5 : vector<8x256xf32>
    %7 = math.tanh %6 : vector<8x256xf32>
    %8 = arith.truncf %7 : vector<8x256xf32> to vector<8x256xbf16>
    %c0_5 = arith.constant 0 : index
    %c0_6 = arith.constant 0 : index
    %9 = vector.load %arg5[%c0_5, %c0_6] : memref<256x128xbf16, #tpu.memory_space<vmem>>, vector<256x128xbf16>
    %cst_7 = arith.constant dense<0.000000e+00> : vector<8x128xf32>
    %10 = tpu.matmul %8, %9, %cst_7 {dimension_numbers = #tpu.dot_dimension_numbers<[1], [0], [0], [1], [0, 0, 1, 1], [], []>} : vector<8x256xbf16>, vector<256x128xbf16>, vector<8x128xf32> -> vector<8x128xf32>
    %c0_8 = arith.constant 0 : index
    %c0_9 = arith.constant 0 : index
    %11 = vector.load %arg6[%c0_8, %c0_9] : memref<1x128xf32, #tpu.memory_space<vmem>>, vector<1x128xf32>
    %12 = vector.broadcast %11 : vector<1x128xf32> to vector<8x128xf32>
    %13 = arith.addf %10, %12 : vector<8x128xf32>
    %14 = math.tanh %13 : vector<8x128xf32>
    %15 = arith.truncf %14 : vector<8x128xf32> to vector<8x128xbf16>
    %c0_10 = arith.constant 0 : index
    %c0_11 = arith.constant 0 : index
    %16 = vector.load %arg7[%c0_10, %c0_11] : memref<128x128xbf16, #tpu.memory_space<vmem>>, vector<128x128xbf16>
    %cst_12 = arith.constant dense<0.000000e+00> : vector<8x128xf32>
    %17 = tpu.matmul %15, %16, %cst_12 {dimension_numbers = #tpu.dot_dimension_numbers<[1], [0], [0], [1], [0, 0, 1, 1], [], []>} : vector<8x128xbf16>, vector<128x128xbf16>, vector<8x128xf32> -> vector<8x128xf32>
    %c0_13 = arith.constant 0 : index
    %c0_14 = arith.constant 0 : index
    %18 = vector.load %arg8[%c0_13, %c0_14] : memref<1x128xf32, #tpu.memory_space<vmem>>, vector<1x128xf32>
    %19 = vector.broadcast %18 : vector<1x128xf32> to vector<8x128xf32>
    %20 = arith.addf %17, %19 : vector<8x128xf32>
    %c0_15 = arith.constant 0 : index
    %c0_16 = arith.constant 0 : index
    %21 = vector.load %arg2[%c0_15, %c0_16] : memref<8x128xf32, #tpu.memory_space<vmem>>, vector<8x128xf32>
    %22 = arith.addf %20, %21 : vector<8x128xf32>
    %cst_17 = arith.constant dense<0xFF800000> : vector<8xf32>
    %23 = vector.multi_reduction <maximumf>, %22, %cst_17 [1] : vector<8x128xf32> to vector<8xf32>
    %24 = vector.shape_cast %23 : vector<8xf32> to vector<8x1xf32>
    %25 = vector.broadcast %24 : vector<8x1xf32> to vector<8x128xf32>
    %26 = arith.subf %22, %25 : vector<8x128xf32>
    %27 = math.exp %26 : vector<8x128xf32>
    %cst_18 = arith.constant dense<0.000000e+00> : vector<8xf32>
    %28 = vector.multi_reduction <add>, %27, %cst_18 [1] : vector<8x128xf32> to vector<8xf32>
    %29 = vector.shape_cast %28 : vector<8xf32> to vector<8x1xf32>
    %30 = math.log %29 : vector<8x1xf32>
    %31 = vector.broadcast %30 : vector<8x1xf32> to vector<8x128xf32>
    %32 = arith.subf %26, %31 : vector<8x128xf32>
    %c0_19 = arith.constant 0 : index
    %c0_20 = arith.constant 0 : index
    %33 = vector.load %arg10[%c0_19, %c0_20] : memref<8x128xf32, #tpu.memory_space<vmem>>, vector<8x128xf32>
    tpu.vector_store %arg10[%c0_19, %c0_20], %32 {strides = array<i32>} : memref<8x128xf32, #tpu.memory_space<vmem>>, vector<8x128xf32>,
    %34 = tpu.iota {dimensions = array<i32: 1>} : vector<8x128xi32>
    %c8_i32 = arith.constant 8 : i32
    %35 = vector.broadcast %c8_i32 : i32 to vector<8x128xi32>
    %36 = arith.cmpi eq, %34, %35 : vector<8x128xi32>
    %37 = arith.select %36, %20, %22 : vector<8x128xi1>, vector<8x128xf32>
    %c0_21 = arith.constant 0 : index
    %c0_22 = arith.constant 0 : index
    %38 = vector.load %arg9[%c0_21, %c0_22] : memref<8x128xf32, #tpu.memory_space<vmem>>, vector<8x128xf32>
    tpu.vector_store %arg9[%c0_21, %c0_22], %37 {strides = array<i32>} : memref<8x128xf32, #tpu.memory_space<vmem>>, vector<8x128xf32>,
    return
  }
  func.func @transform_0(%arg0: i32) -> (i32, i32) {
    %c0_i32 = arith.constant 0 : i32
    %c0_i32_0 = arith.constant 0 : i32
    return %arg0, %c0_i32 : i32, i32
  }
  func.func @transform_1(%arg0: i32) -> (i32, i32) {
    %c0_i32 = arith.constant 0 : i32
    %c0_i32_0 = arith.constant 0 : i32
    return %arg0, %c0_i32 : i32, i32
  }
  func.func @transform_2(%arg0: i32) -> (i32, i32) {
    %c0_i32 = arith.constant 0 : i32
    %c0_i32_0 = arith.constant 0 : i32
    %c0_i32_1 = arith.constant 0 : i32
    return %c0_i32, %c0_i32_0 : i32, i32
  }
  func.func @transform_3(%arg0: i32) -> (i32, i32) {
    %c0_i32 = arith.constant 0 : i32
    %c0_i32_0 = arith.constant 0 : i32
    %c0_i32_1 = arith.constant 0 : i32
    return %c0_i32, %c0_i32_0 : i32, i32
  }
  func.func @transform_4(%arg0: i32) -> (i32, i32) {
    %c0_i32 = arith.constant 0 : i32
    %c0_i32_0 = arith.constant 0 : i32
    %c0_i32_1 = arith.constant 0 : i32
    return %c0_i32, %c0_i32_0 : i32, i32
  }
  func.func @transform_5(%arg0: i32) -> (i32, i32) {
    %c0_i32 = arith.constant 0 : i32
    %c0_i32_0 = arith.constant 0 : i32
    %c0_i32_1 = arith.constant 0 : i32
    return %c0_i32, %c0_i32_0 : i32, i32
  }
  func.func @transform_6(%arg0: i32) -> (i32, i32) {
    %c0_i32 = arith.constant 0 : i32
    %c0_i32_0 = arith.constant 0 : i32
    %c0_i32_1 = arith.constant 0 : i32
    return %c0_i32, %c0_i32_0 : i32, i32
  }
  func.func @transform_7(%arg0: i32) -> (i32, i32) {
    %c0_i32 = arith.constant 0 : i32
    %c0_i32_0 = arith.constant 0 : i32
    %c0_i32_1 = arith.constant 0 : i32
    return %c0_i32, %c0_i32_0 : i32, i32
  }
  func.func @transform_8(%arg0: i32) -> (i32, i32) {
    %c0_i32 = arith.constant 0 : i32
    %c0_i32_0 = arith.constant 0 : i32
    return %arg0, %c0_i32 : i32, i32
  }
  func.func @transform_9(%arg0: i32) -> (i32, i32) {
    %c0_i32 = arith.constant 0 : i32
    %c0_i32_0 = arith.constant 0 : i32
    return %arg0, %c0_i32 : i32, i32
  }
}

</mosaic_0001>

<bundles_post_ra>
// kernel: tpu_custom_call.1
= control target key start
LH: loop header
LB: loop body
LE: loop exit
PB: predicated region body
PF: predicated region fallthrough
CT: control target
= control target key end

     0   :  { %15 = vsyncpa [#allocation3], 0  ;;  %s1096_s0 = inlined_call_operand.hbm [shape: f32[8,128], index: 0, kind: input, shape index: {}]   ;;  %s1097_s1 = inlined_call_operand.hbm [shape: f32[8,128], index: 1, kind: input, shape index: {}]   ;;  %s1098_s2 = inlined_call_operand.hbm [shape: bf16[128,256], index: 2, kind: input, shape index: {}]   ;;  %s1099_s3 = inlined_call_operand.vmem [shape: f32[1,256], index: 3, kind: input, shape index: {}]   ;;  %s1100_s4 = inlined_call_operand.hbm [shape: bf16[256,128], index: 4, kind: input, shape index: {}]   ;;  %s1101_s5 = inlined_call_operand.vmem [shape: f32[1,128], index: 5, kind: input, shape index: {}]   ;;  %s1102_s6 = inlined_call_operand.hbm [shape: bf16[128,128], index: 6, kind: input, shape index: {}]   ;;  %s1103_s7 = inlined_call_operand.vmem [shape: f32[1,128], index: 7, kind: input, shape index: {}]   ;;  %s1104_s8 = inlined_call_operand.hbm [shape: f32[8,128], index: 8, kind: output, shape index: {0}]   ;;  %s1105_s9 = inlined_call_operand.hbm [shape: f32[8,128], index: 9, kind: output, shape index: {1}]  }
   0x1   :  { %16 = vsyncpa [#allocation6], 0 }
   0x2   :  { %17 = vsyncpa [#allocation9], 0 }
   0x3   :  { %18 = vsyncpa [#allocation4], 0 }
   0x4   :  { %19 = vsyncpa [#allocation13], 0  ;;  %s919_s30 = smov [#allocation5]   ;;  %s920_s11 = smov [#allocation8]  }
   0x5   :  { %s36_s10 = sshll.u32 %s919_s30, 4  ;;  %s59_s12 = sshll.u32 %s920_s11, 4  ;;  %s37_s10 = int_to_ptr.vmem [resolvable:$true] %s36_s10  ;;  %s983_s12 = int_to_ptr.vmem [resolvable:$true] %s59_s12 }
   0x6   :  { %s755_s15 = scalar_lea.hbm %s1097_s1, 128 }
   0x7   :  { %p756_p0 = scmp.ne.s32.totalorder %s1097_s1, %s755_s15  ;;  %p759_p1 = scmp.lt.u32.totalorder %s755_s15, %s1097_s1 }
   0x9   :  { %p761_p2 = pnand %p759_p1, %p756_p0 }
   0xb   :  { %764 = shalt.err (!%p761_p2)
}
   0xc   :  { %s765_s20 = scalar_lea.vmem %s37_s10, 128  ;;  %p770_p4 = scmp.lt.s32.totalorder %s37_s10, %s37_s10 }
   0xd   :  { %p766_p3 = scmp.ne.s32.totalorder %s37_s10, %s765_s20  ;;  %p771_p5 = scmp.lt.s32.totalorder %s765_s20, %s765_s20 }
   0xf   :  { %p772_p6 = por %p771_p5, %p770_p4 }
  0x11   :  { %p773_p7 = pnand %p772_p6, %p766_p3 }
  0x13   :  { %776 = shalt.err (!%p773_p7)
}
  0x14   :  { %39 = dma.hbm_to_vmem [thread:$0]  %s1097_s1, 128, %s37_s10, [#allocation6]  }
  0x15   :  { %s777_s25 = scalar_lea.hbm %s1100_s4, 2048 }
  0x16   :  { %p778_p8 = scmp.ne.s32.totalorder %s1100_s4, %s777_s25  ;;  %p781_p9 = scmp.lt.u32.totalorder %s777_s25, %s1100_s4 }
  0x18   :  { %p783_p10 = pnand %p781_p9, %p778_p8 }
  0x1a   :  { %786 = shalt.err (!%p783_p10)
}
  0x1b   :  { %s787_s30 = scalar_lea.vmem %s983_s12, 2048  ;;  %p792_p12 = scmp.lt.s32.totalorder %s983_s12, %s983_s12 }
  0x1c   :  { %p788_p11 = scmp.ne.s32.totalorder %s983_s12, %s787_s30  ;;  %p793_p13 = scmp.lt.s32.totalorder %s787_s30, %s787_s30 }
  0x1e   :  { %p794_p0 = por %p793_p13, %p792_p12 }
  0x20   :  { %p795_p1 = pnand %p794_p0, %p788_p11 }
  0x22   :  { %798 = shalt.err (!%p795_p1)
}
  0x23   :  { %s921_s1 = smov 64   ;;  %s922_s10 = smov 4  }
  0x24   :  { %65 = dma.hbm_to_vmem [thread:$0]  %s1100_s4, 2048, %s983_s12, [#allocation9], %s921_s1, %s921_s1, %s922_s10  }
  0x25   :  { %s923_s14 = smov [#allocation2]   ;;  %s924_s16 = smov [#allocation7]  }
  0x26   :  { %s26_s15 = sshll.u32 %s923_s14, 4  ;;  %s45_s17 = sshll.u32 %s924_s16, 4  ;;  %s27_s15 = int_to_ptr.vmem [resolvable:$true] %s26_s15  ;;  %s1017_s17 = int_to_ptr.vmem [resolvable:$true] %s45_s17 }
  0x27   :  { %s799_s20 = scalar_lea.hbm %s1096_s0, 128 }
  0x28   :  { %p800_p2 = scmp.ne.s32.totalorder %s1096_s0, %s799_s20  ;;  %p803_p3 = scmp.lt.u32.totalorder %s799_s20, %s1096_s0 }
  0x2a   :  { %p805_p4 = pnand %p803_p3, %p800_p2 }
  0x2c   :  { %808 = shalt.err (!%p805_p4)
}
  0x2d   :  { %s809_s4 = scalar_lea.vmem %s27_s15, 128  ;;  %p814_p6 = scmp.lt.s32.totalorder %s27_s15, %s27_s15 }
  0x2e   :  { %p810_p5 = scmp.ne.s32.totalorder %s27_s15, %s809_s4  ;;  %p815_p7 = scmp.lt.s32.totalorder %s809_s4, %s809_s4 }
  0x30   :  { %p816_p8 = por %p815_p7, %p814_p6 }
  0x32   :  { %p817_p9 = pnand %p816_p8, %p810_p5 }
  0x34   :  { %820 = shalt.err (!%p817_p9)
}
  0x35   :  { %29 = dma.hbm_to_vmem [thread:$0]  %s1096_s0, 128, %s27_s15, [#allocation3]  }
  0x36   :  { %s821_s28 = scalar_lea.hbm %s1098_s2, 2048 }
  0x37   :  { %p822_p10 = scmp.ne.s32.totalorder %s1098_s2, %s821_s28  ;;  %p825_p11 = scmp.lt.u32.totalorder %s821_s28, %s1098_s2 }
  0x39   :  { %p827_p12 = pnand %p825_p11, %p822_p10 }
  0x3b   :  { %830 = shalt.err (!%p827_p12)
}
  0x3c   :  { %s831_s14 = scalar_lea.vmem %s1017_s17, 2048  ;;  %p836_p0 = scmp.lt.s32.totalorder %s1017_s17, %s1017_s17 }
  0x3d   :  { %p832_p13 = scmp.ne.s32.totalorder %s1017_s17, %s831_s14  ;;  %p837_p1 = scmp.lt.s32.totalorder %s831_s14, %s831_s14 }
  0x3f   :  { %p838_p2 = por %p837_p1, %p836_p0 }
  0x41   :  { %p839_p3 = pnand %p838_p2, %p832_p13 }
  0x43   :  { %842 = shalt.err (!%p839_p3)
}
  0x44   :  { %s925_s0 = smov 128   ;;  %s926_s15 = smov 8  }
  0x45   :  { %51 = dma.hbm_to_vmem [thread:$0]  %s1098_s2, 2048, %s1017_s17, [#allocation6], %s925_s0, %s925_s0, %s926_s15  }
  0x46   :  { %s927_s19 = smov [#allocation10]   ;;  %s843_s23 = scalar_lea.hbm %s1102_s6, 1024 }
  0x47   :  { %s73_s20 = sshll.u32 %s927_s19, 4  ;;  %p844_p4 = scmp.ne.s32.totalorder %s1102_s6, %s843_s23  ;;  %s74_s20 = int_to_ptr.vmem [resolvable:$true] %s73_s20 }
  0x48   :  { %p847_p5 = scmp.lt.u32.totalorder %s843_s23, %s1102_s6 }
  0x4a   :  { %p849_p6 = pnand %p847_p5, %p844_p4 }
  0x4c   :  { %852 = shalt.err (!%p849_p6)
}
  0x4d   :  { %s853_s26 = scalar_lea.vmem %s74_s20, 1024  ;;  %p858_p8 = scmp.lt.s32.totalorder %s74_s20, %s74_s20 }
  0x4e   :  { %p854_p7 = scmp.ne.s32.totalorder %s74_s20, %s853_s26  ;;  %p859_p9 = scmp.lt.s32.totalorder %s853_s26, %s853_s26 }
  0x50   :  { %p860_p10 = por %p859_p9, %p858_p8 }
  0x52   :  { %p861_p11 = pnand %p860_p10, %p854_p7 }
  0x54   :  { %864 = shalt.err (!%p861_p11)
}
  0x55   :  { %79 = dma.hbm_to_vmem [thread:$0]  %s1102_s6, 1024, %s74_s20, [#allocation9], %s921_s1, %s921_s1, %s922_s10  }
  0x56   :  { %909 = dma.done.wait [#allocation3], 128  }
  0x57   :  { %910 = vsyncadd [#allocation3], 4294967168 }
  0x58   :  { %911 = dma.done.wait [#allocation6], 2176  }
  0x59   :  { %912 = vsyncadd [#allocation6], 4294965120 }
  0x5a   :  { %913 = dma.done.wait [#allocation9], 3072  }
  0x5b   :  { %914 = vsyncadd [#allocation9], 4294964224  ;;  %v928_v0 = vmov 0   ;;  %v697_v1 = vld [vmem:[#allocation7 + $0x4] ss:$8 sps:$4 sm:$0xff]   ;;  %v725_v15 = vld [vmem:[#allocation8 + $0x50] sm:$0xff]   ;;  %v118_v39 = vlaneseq }
  0x5c   :  { %240 = vmatprep.mubr.bf16.mxu0 %v928_v0  ;;  %v699_v2 = vld [vmem:[#allocation7] ss:$8 sps:$4 sm:$0xff]   ;;  %208 = vmatprep.subr.bf16.mxu0 %v697_v1  ;;  %v700_v3 = vld [vmem:[#allocation7 + $0x14] ss:$8 sps:$4 sm:$0xff]   ;;  %v702_v4 = vld [vmem:[#allocation7 + $0x10] ss:$8 sps:$4 sm:$0xff]  }
  0x5d   :  { %209 = vmatpush1.bf16.msra.mxu0 %v699_v2  ;;  %v703_v5 = vld [vmem:[#allocation7 + $0x24] ss:$8 sps:$4 sm:$0xff]   ;;  %v705_v6 = vld [vmem:[#allocation7 + $0x20] ss:$8 sps:$4 sm:$0xff]   ;;  %v706_v7 = vld [vmem:[#allocation7 + $0x34] ss:$8 sps:$4 sm:$0xff]  }
  0x5e   :  { %210 = vmatprep.subr.bf16.mxu0 %v700_v3  ;;  %v708_v8 = vld [vmem:[#allocation7 + $0x30] ss:$8 sps:$4 sm:$0xff]   ;;  %v709_v9 = vld [vmem:[#allocation7 + $0x44] ss:$8 sps:$4 sm:$0xff]   ;;  %v711_v12 = vld [vmem:[#allocation7 + $0x40] ss:$8 sps:$4 sm:$0xff]  }
  0x5f   :  { %v721_v10 = vld [vmem:[#allocation8 + $0x40] sm:$0xff]   ;;  %v723_v13 = vld [vmem:[#allocation8 + $0x48] sm:$0xff]   ;;  %v712_v16 = vld [vmem:[#allocation7 + $0x54] ss:$8 sps:$4 sm:$0xff]   ;;  %v929_v36 = vmov 0.0   ;;  %v119_v40 = vshrl.u32 %v118_v39, 7 }
  0x60   :  { %v722_v11 = vld [vmem:[#allocation8] sm:$0xff]   ;;  %632 = vmatprep.subr.bf16.mxu1 %v721_v10  ;;  %v724_v14 = vld [vmem:[#allocation8 + $0x8] sm:$0xff]   ;;  %v714_v17 = vld [vmem:[#allocation7 + $0x50] ss:$8 sps:$4 sm:$0xff]   ;;  %vm930_vm0 = vmmov 0  }
  0x61   :  { %211 = vmatpush1.bf16.msra.mxu0 %v702_v4  ;;  %633 = vmatpush3.bf16.msra.mxu1 %v722_v11  ;;  %v715_v18 = vld [vmem:[#allocation7 + $0x64] ss:$8 sps:$4 sm:$0xff]   ;;  %v726_v19 = vld [vmem:[#allocation8 + $0x10] sm:$0xff]   ;;  %v727_v20 = vld [vmem:[#allocation8 + $0x58] sm:$0xff]   ;;  %v120_v41 = vsub.s32 0, %v119_v40  ;;  %v124_v43 = vsub.s32 1, %v119_v40 }
  0x62   :  { %212 = vmatprep.subr.bf16.mxu0 %v703_v5  ;;  %634 = vmatprep.subr.bf16.mxu1 %v723_v13  ;;  %v728_v21 = vld [vmem:[#allocation8 + $0x18] sm:$0xff]   ;;  %v717_v22 = vld [vmem:[#allocation7 + $0x60] ss:$8 sps:$4 sm:$0xff]   ;;  %v98_v25 = vld [vmem:[#allocation2] sm:$0xff] }
  0x63   :  { %v718_v23 = vld [vmem:[#allocation7 + $0x74] ss:$8 sps:$4 sm:$0xff]   ;;  %v720_v24 = vld [vmem:[#allocation7 + $0x70] ss:$8 sps:$4 sm:$0xff]   ;;  %v99_v26 = vpack.c.bf16 %v98_v25, %v98_v25  ;;  %v729_v27 = vld [vmem:[#allocation8 + $0x60] sm:$0xff]  }
  0x64   :  { %v730_v28 = vld [vmem:[#allocation8 + $0x20] sm:$0xff]   ;;  %v731_v29 = vld [vmem:[#allocation8 + $0x68] sm:$0xff]   ;;  %v733_v31 = vld [vmem:[#allocation8 + $0x70] sm:$0xff]  }
  0x65   :  { %213 = vmatpush1.bf16.msra.mxu0 %v705_v6  ;;  %635 = vmatpush3.bf16.msra.mxu1 %v724_v14  ;;  %v732_v30 = vld [vmem:[#allocation8 + $0x28] sm:$0xff]   ;;  %v734_v32 = vld [vmem:[#allocation8 + $0x30] sm:$0xff]   ;;  %v735_v33 = vld [vmem:[#allocation8 + $0x78] sm:$0xff]  }
  0x66   :  { %214 = vmatprep.subr.bf16.mxu0 %v706_v7  ;;  %636 = vmatprep.subr.bf16.mxu1 %v725_v15  ;;  %v736_v34 = vld [vmem:[#allocation8 + $0x38] sm:$0xff]   ;;  %v737_v35 = vld [vmem:[#allocation10] sm:$0xff]   ;;  %v738_v37 = vld [vmem:[#allocation10 + $0x8] sm:$0xff]   ;;  %v555_v7 = vand.u32 127, %v118_v39 }
  0x67   :  { %v739_v38 = vld [vmem:[#allocation10 + $0x10] sm:$0xff]   ;;  %v740_v56 = vld [vmem:[#allocation10 + $0x18] sm:$0xff]   ;;  %v741_v57 = vld [vmem:[#allocation10 + $0x20] sm:$0xff]  }
  0x68   :  { %v116_v42 = vld [vmem:[%s1099_s3] sm:$0x3]  ;;  %v742_v58 = vld [vmem:[#allocation10 + $0x28] sm:$0xff]   ;;  %v744_v60 = vld [vmem:[#allocation10 + $0x38] sm:$0xff]   ;;  %vm556_vm1 = vcmp.eq.s32.totalorder %v555_v7, 8 }
  0x69   :  { %215 = vmatpush1.bf16.msra.mxu0 %v708_v8  ;;  %637 = vmatpush3.bf16.msra.mxu1 %v726_v19  ;;  %v121_v44 = vrot.slane %v116_v42, %v120_v41  ;;  %v125_v45 = vrot.slane %v116_v42, %v124_v43  ;;  %v743_v59 = vld [vmem:[#allocation10 + $0x30] sm:$0xff]  }
  0x6a   :  { %216 = vmatprep.subr.bf16.mxu0 %v709_v9  ;;  %638 = vmatprep.subr.bf16.mxu1 %v727_v20  ;;  %v606_v62 = vld [vmem:[%s1101_s5] ss:$0 sm:$0xff]  ;;  %v541_v9 = vld [vmem:[#allocation5] sm:$0xff]  ;;  %s931_s5 = smov [#allocation11]  }
  0x6b   :  { %v623_v6 = vld [vmem:[%s1103_s7] ss:$0 sm:$0xff]  ;;  %s565_s7 = sshll.u32 %s931_s5, 4  ;;  %s566_s7 = int_to_ptr.vmem [resolvable:$true] %s565_s7 }
  0x6c   :  { %s865_s29 = scalar_lea.vmem %s566_s7, 128  ;;  %p870_p13 = scmp.lt.s32.totalorder %s566_s7, %s566_s7 }
  0x6d   :  { %217 = vmatpush1.bf16.msra.mxu0 %v711_v12  ;;  %639 = vmatpush3.bf16.msra.mxu1 %v728_v21  ;;  %p866_p12 = scmp.ne.s32.totalorder %s566_s7, %s865_s29  ;;  %p871_p0 = scmp.lt.s32.totalorder %s865_s29, %s865_s29 }
  0x6e   :  { %218 = vmatprep.subr.bf16.mxu0 %v712_v16  ;;  %640 = vmatprep.subr.bf16.mxu1 %v729_v27 }
  0x6f   :  { %p872_p1 = por %p871_p0, %p870_p13 }
  0x71   :  { %219 = vmatpush1.bf16.msra.mxu0 %v714_v17  ;;  %641 = vmatpush3.bf16.msra.mxu1 %v730_v28  ;;  %p873_p2 = pnand %p872_p1, %p866_p12 }
  0x72   :  { %220 = vmatprep.subr.bf16.mxu0 %v715_v18  ;;  %642 = vmatprep.subr.bf16.mxu1 %v731_v29 }
  0x75   :  { %221 = vmatpush1.bf16.msra.mxu0 %v717_v22  ;;  %643 = vmatpush3.bf16.msra.mxu1 %v732_v30 }
  0x76   :  { %222 = vmatprep.subr.bf16.mxu0 %v718_v23  ;;  %644 = vmatprep.subr.bf16.mxu1 %v733_v31 }
  0x79   :  { %223 = vmatpush1.bf16.msra.mxu0 %v720_v24  ;;  %645 = vmatpush3.bf16.msra.mxu1 %v734_v32 }
  0x7a   :  { %646 = vmatprep.subr.bf16.mxu1 %v735_v33  ;;  %663 = vmatprep.subr.bf16.mxu0 %v929_v36 }
  0x7c   :  { %241 = vmatmul.mubr.bf16.vlgmr.msra.gmra.mrb[0].mxu0 %v99_v26 }
  0x7d   :  { %647 = vmatpush3.bf16.msra.mxu1 %v736_v34  ;;  %664 = vmatpush3.bf16.msra.mxu0 %v737_v35 }
  0x7e   :  { %665 = vmatprep.subr.bf16.mxu0 %v929_v36  ;;  %679 = vmatprep.mubr.msk.bf16.mxu0 %vm930_vm0, %v929_v36 }
  0x81   :  { %666 = vmatpush3.bf16.msra.mxu0 %v738_v37 }
  0x82   :  { %667 = vmatprep.subr.bf16.mxu0 %v929_v36 }
  0x85   :  { %668 = vmatpush3.bf16.msra.mxu0 %v739_v38 }
  0x86   :  { %669 = vmatprep.subr.bf16.mxu0 %v929_v36 }
  0x89   :  { %670 = vmatpush3.bf16.msra.mxu0 %v740_v56 }
  0x8a   :  { %671 = vmatprep.subr.bf16.mxu0 %v929_v36 }
  0x8d   :  { %672 = vmatpush3.bf16.msra.mxu0 %v741_v57 }
  0x8e   :  { %673 = vmatprep.subr.bf16.mxu0 %v929_v36 }
  0x91   :  { %674 = vmatpush3.bf16.msra.mxu0 %v742_v58 }
  0x92   :  { %675 = vmatprep.subr.bf16.mxu0 %v929_v36 }
  0x95   :  { %676 = vmatpush3.bf16.msra.mxu0 %v743_v59 }
  0x96   :  { %677 = vmatprep.subr.bf16.mxu0 %v929_v36 }
  0x99   :  { %678 = vmatpush3.bf16.msra.mxu0 %v744_v60 }
 0x14f   :  { %v242_v46 = vpop.f32.mrb[0].mxu0 }
 0x150   :  { %v243_v47 = vadd.f32 %v242_v46, %v121_v44  ;;  %v244_v48 = vpop.f32.mrb[1].mxu0 }
 0x151   :  { %v245_v49 = vadd.f32 %v244_v48, %v125_v45  ;;  %v246_v50 = vpop.f32.mrb[2].mxu0 }
 0x152   :  { %745 = vtanh.f32 %v243_v47  ;;  %v247_v51 = vpop.f32.mrb[3].mxu0 }
 0x153   :  { %747 = vtanh.f32 %v245_v49 }
 0x15c   :  { %v746_v52 = vpop.eup %745 }
 0x15d   :  { %v748_v53 = vpop.eup %747  ;;  %v251_v55 = vpack.c.bf16 %v746_v52, %v746_v52 }
 0x15e   :  { %v252_v54 = vpack.c.bf16 %v748_v53, %v748_v53 }
 0x160   :  { %420 = vmatprep.mubr.bf16.mxu1 %v252_v54 }
 0x161   :  { %421 = vmatmul.mubr.bf16.vlgmr.msra.gmra.mrb[0].mxu1 %v251_v55 }
 0x234   :  { %v648_v61 = vpop.f32.mrb[0].mxu1 }
 0x235   :  { %v649_v63 = vpop.f32.mrb[1].mxu1 }
 0x236   :  { %v650_v0 = vadd.f32 %v649_v63, %v648_v61  ;;  %v651_v1 = vpop.f32.mrb[2].mxu1 }
 0x237   :  { %v652_v2 = vpop.f32.mrb[3].mxu1 }
 0x238   :  { %v423_v3 = vadd.f32 %v650_v0, %v606_v62 }
 0x23a   :  { %749 = vtanh.f32 %v423_v3 }
 0x244   :  { %v750_v4 = vpop.eup %749 }
 0x245   :  { %v429_v5 = vpack.c.bf16 %v750_v4, %v750_v4 }
 0x247   :  { %680 = vmatmul.mubr.bf16.vlgmr.msra.gmra.mrb[4].mxu0 %v429_v5 }
 0x31a   :  { %v535_v8 = vpop.f32.mrb[4].mxu0 }
 0x31b   :  { %v536_v10 = vadd.f32 %v623_v6, %v535_v8  ;;  %v681_v11 = vpop.f32.mrb[5].mxu0 }
 0x31c   :  { %v538_v12 = vpop.f32.mrb[6].mxu0 }
 0x31d   :  { %v542_v13 = vadd.f32 %v541_v9, %v536_v10  ;;  %v682_v14 = vpop.f32.mrb[7].mxu0 }
 0x31f   :  { %543 = vmax.xlane.f32.xlu0 %v542_v13  ;;  %v557_v15 = vsel %vm556_vm1, %v536_v10, %v542_v13 }
 0x320   :  { %558 = vst [vmem:[#allocation11] sm:$0xff] %v557_v15 }
 0x3ac   :  { %v544_v16 = vpop.xlane.xlu0 %543 }
 0x3ad   :  { %v545_v17 = vsub.f32 %v542_v13, %v544_v16 }
 0x3af   :  { %v546_v18 = vmul.f32 1.442695, %v545_v17 }
 0x3b1   :  { %751 = vpow2.f32 %v546_v18 }
 0x3bb   :  { %v752_v19 = vpop.eup %751 }
 0x3bc   :  { %548 = vadd.xlane.f32.xlu0 %v752_v19 }
 0x3bd   :  { %876 = shalt.err (!%p873_p2)
}
 0x3be   :  { %s877_s13 = scalar_lea.hbm %s1104_s8, 128 }
 0x3bf   :  { %p878_p3 = scmp.ne.s32.totalorder %s1104_s8, %s877_s13  ;;  %p881_p4 = scmp.lt.u32.totalorder %s877_s13, %s1104_s8 }
 0x3c1   :  { %p883_p5 = pnand %p881_p4, %p878_p3 }
 0x3c3   :  { %886 = shalt.err (!%p883_p5)
}
 0x3c4   :  { %568 = dma.vmem_to_hbm [thread:$0]  %s566_s7, 128, %s1104_s8, [#allocation4]  }
 0x3c5   :  { %s932_s20 = smov [#allocation12]  }
 0x3c6   :  { %s575_s21 = sshll.u32 %s932_s20, 4  ;;  %s576_s21 = int_to_ptr.vmem [resolvable:$true] %s575_s21 }
 0x3c7   :  { %s887_s22 = scalar_lea.vmem %s576_s21, 128  ;;  %p892_p7 = scmp.lt.s32.totalorder %s576_s21, %s576_s21 }
 0x3c8   :  { %p888_p6 = scmp.ne.s32.totalorder %s576_s21, %s887_s22  ;;  %p893_p8 = scmp.lt.s32.totalorder %s887_s22, %s887_s22 }
 0x3ca   :  { %p894_p9 = por %p893_p8, %p892_p7 }
 0x3cc   :  { %p895_p10 = pnand %p894_p9, %p888_p6 }
 0x449   :  { %v549_v20 = vpop.xlane.xlu0 %548 }
 0x44a   :  { %753 = vlog2.f32 %v549_v20 }
 0x454   :  { %v754_v21 = vpop.eup %753 }
 0x455   :  { %v551_v22 = vmul.f32 0.6931472, %v754_v21 }
 0x457   :  { %v552_v23 = vsub.f32 %v545_v17, %v551_v22 }
 0x459   :  { %553 = vst [vmem:[#allocation12] sm:$0xff] %v552_v23 }
 0x45a   :  { %898 = shalt.err (!%p895_p10)
}
 0x45b   :  { %s899_s8 = scalar_lea.hbm %s1105_s9, 128 }
 0x45c   :  { %p900_p11 = scmp.ne.s32.totalorder %s1105_s9, %s899_s8  ;;  %p903_p12 = scmp.lt.u32.totalorder %s899_s8, %s1105_s9 }
 0x45e   :  { %p905_p13 = pnand %p903_p12, %p900_p11 }
 0x460   :  { %908 = shalt.err (!%p905_p13)
}
 0x461   :  { %578 = dma.vmem_to_hbm [thread:$0]  %s576_s21, 128, %s1105_s9, [#allocation13]  }
 0x462   :  { %915 = dma.done.wait [#allocation4], 128  }
 0x463   :  { %916 = vsyncadd [#allocation4], 4294967168 }
 0x464   :  { %917 = dma.done.wait [#allocation13], 128  }
 0x465   :  { %918 = vsyncadd [#allocation13], 4294967168 }
 0x466   :  { %585 = vsyncpa [#allocation3], 1 }
 0x467   :  { %586 = vsyncpa [#allocation6], 1 }
 0x468   :  { %587 = vsyncpa [#allocation9], 1 }
 0x469   :  { %588 = vsyncpa [#allocation4], 1 }
 0x46a   :  { %589 = vsyncpa [#allocation13], 1 }

</bundles_post_ra>
